<compile_context>
chip_gen: v7x
topology: tpu7x:2x2x1
jax: 0.10.0
libtpu: 0.0.40
codegen_flags: <defaults>
</compile_context>

<pallas_src>
import jax
import jax.numpy as jnp
from jax.experimental import pallas as pl
from jax.experimental.pallas import tpu as pltpu

_LANES = 128
_SUBLANES = 8
_MIN_TILE_B = _LANES * _SUBLANES  # 1024: smallest batch tile with full vregs


def _round_up(a, b):
    return ((a + b - 1) // b) * b


def coxph_kernel(w_ref, x_ref, o_ref):
    """o = exp(sum_d w[d] * x[d]) for one feature-major batch tile.

    w_ref: (D,)             SMEM, scalar-prefetched fc1 weight row
    x_ref: (D, rows, 128)   VMEM, feature-major batch tile (batch = rows*128)
    o_ref: (rows, 128)      VMEM, lane-dense hazard ratios
    """
    ndim = x_ref.shape[0]
    # Unrolled AXPY over the small, static feature dim: scalar * vreg FMAs on
    # the VPU; accumulation is f32 even when the input stream is bf16.
    acc = (w_ref[0] * x_ref[0]).astype(jnp.float32)
    for d in range(1, ndim):
        acc = acc + w_ref[d] * x_ref[d]
    o_ref[...] = jnp.exp(acc).astype(o_ref.dtype)  # EUP slot


def coxph_forward(x, w, *, tile_b=131072, input_dtype=jnp.float32,
                  vmem_limit_bytes=None, feature_major=False):
    """CoxPH hazard ratio exp(x @ w.T) -> (B, 1) float32.

    x: (B, D), or (D, B) if feature_major=True (preferred caller contract:
       avoids the wrapper-side transpose).
    w: (1, D) torch fc1.weight layout, or (D,).
    """
    w_flat = jnp.asarray(w, dtype=jnp.float32).reshape(-1)
    ndim = w_flat.shape[0]

    if feature_major:
        assert x.shape[0] == ndim, (x.shape, ndim)
        xt = x                                   # (D, B), already feature-major
    else:
        assert x.shape[1] == ndim, (x.shape, ndim)
        xt = x.T                                 # (D, B); in production prefer
                                                 # a feature-major caller contract
    batch = xt.shape[1]

    # Batch tiling: tile_b multiple of 8*128 so output blocks are full vregs;
    # shrink the tile for small batches so we don't DMA megabytes of padding.
    tile_b = max(_MIN_TILE_B, _round_up(tile_b, _MIN_TILE_B))
    tile_b = min(tile_b, _round_up(batch, _MIN_TILE_B))
    b_pad = _round_up(batch, tile_b)
    grid = b_pad // tile_b
    tile_rows = tile_b // _LANES
    r_pad = b_pad // _LANES

    if b_pad != batch:
        # Zero-pad the tail: pad lanes compute exp(0) = 1 and are sliced off
        # below, so no garbage ever reaches exp.
        xt = jnp.pad(xt, ((0, 0), (0, b_pad - batch)))
    x_fm = xt.astype(input_dtype).reshape(ndim, r_pad, _LANES)

    itemsize = jnp.dtype(input_dtype).itemsize
    if vmem_limit_bytes is None:
        # Double-buffered x + out tiles plus slack; keep tile_b choices such
        # that this stays well under v7x's 64 MiB physical VMEM.
        tile_bytes = ndim * tile_b * itemsize + tile_b * 4
        vmem_limit_bytes = max(2 * tile_bytes + (4 << 20), 16 << 20)

    out2d = pl.pallas_call(
        coxph_kernel,
        out_shape=jax.ShapeDtypeStruct((r_pad, _LANES), jnp.float32),
        grid_spec=pltpu.PrefetchScalarGridSpec(
            num_scalar_prefetch=1,                       # w -> SMEM
            grid=(grid,),
            in_specs=[pl.BlockSpec((ndim, tile_rows, _LANES),
                                   lambda i, w_sref: (0, i, 0))],
            out_specs=pl.BlockSpec((tile_rows, _LANES),
                                   lambda i, w_sref: (i, 0)),
        ),
        compiler_params=pltpu.CompilerParams(
            dimension_semantics=("parallel",),           # multi-TC batch split
            vmem_limit_bytes=vmem_limit_bytes,
        ),
        cost_estimate=pl.CostEstimate(
            flops=2 * b_pad * ndim,
            transcendentals=b_pad,
            bytes_accessed=b_pad * ndim * itemsize + 4 * ndim + 4 * b_pad,
        ),
    )(w_flat, x_fm)

    return out2d.reshape(b_pad)[:batch].reshape(batch, 1)


if __name__ == "__main__":
    ndim = 10
    batch = 8

    key = jax.random.PRNGKey(0)
    kx, kx2, kw = jax.random.split(key, 3)
    x = jax.random.normal(kx, (batch, ndim), dtype=jnp.float32)

    # Deterministic parameter init matching CoxPHModelTorch.__init__:
    # fc1.weight.data.fill_(0.0), shape (1, ndim)  ->  forward == 1.0.
    w = jnp.zeros((1, ndim), dtype=jnp.float32)

    out = jax.block_until_ready(coxph_forward(x, w))
    ref = jnp.exp(x @ w.T)
    assert out.shape == (batch, 1)
    assert jnp.allclose(out, ref, atol=1e-6), (out, ref)

    # Non-zero weights + batch not a multiple of the pad unit: exercises the
    # AXPY contraction and the zero-pad / slice path.
    batch2 = 20
    x2 = jax.random.normal(kx2, (batch2, ndim), dtype=jnp.float32)
    w2 = 0.1 * jax.random.normal(kw, (1, ndim), dtype=jnp.float32)
    out2 = jax.block_until_ready(coxph_forward(x2, w2))
    ref2 = jnp.exp(x2 @ w2.T)
    assert out2.shape == (batch2, 1)
    assert jnp.allclose(out2, ref2, rtol=1e-5, atol=1e-5), (out2, ref2)

    # Feature-major caller contract (no wrapper transpose).
    out2_fm = jax.block_until_ready(coxph_forward(x2.T, w2, feature_major=True))
    assert jnp.allclose(out2_fm, out2, rtol=1e-6, atol=1e-6)

    # bf16 input path (halves HBM bytes); compare against a bf16-input reference.
    out3 = jax.block_until_ready(coxph_forward(x2, w2, input_dtype=jnp.bfloat16))
    x2_bf = x2.astype(jnp.bfloat16).astype(jnp.float32)
    ref3 = jnp.exp(x2_bf @ w2.T)
    assert jnp.allclose(out3, ref3, rtol=1e-2, atol=1e-2), (out3, ref3)

    print("KERNEL_OK")
</pallas_src>

<mosaic_0001>
module attributes {stable_mosaic.version = 11 : i64} {
  func.func @coxph_kernel(%arg0: i32, %arg1: memref<10xf32, #tpu.memory_space<smem>>, %arg2: memref<10x8x128xf32, #tpu.memory_space<vmem>>, %arg3: memref<8x128xf32, #tpu.memory_space<vmem>>) attributes {dimension_semantics = [#tpu.dimension_semantics<parallel>], iteration_bounds = array<i64: 1>, scalar_prefetch = 1 : i64, scratch_operands = 0 : i64, tpu.core_type = #tpu.core_type<tc>, window_params = [{transform_indices = @transform_0, window_bounds = array<i64: 10, 8, 128>}, {transform_indices = @transform_1, window_bounds = array<i64: 8, 128>}]} {
    %c0 = arith.constant 0 : index
    %0 = memref.load %arg1[%c0] : memref<10xf32, #tpu.memory_space<smem>>
    %c0_0 = arith.constant 0 : index
    %c0_1 = arith.constant 0 : index
    %c0_2 = arith.constant 0 : index
    %1 = vector.load %arg2[%c0_0, %c0_1, %c0_2] : memref<10x8x128xf32, #tpu.memory_space<vmem>>, vector<1x8x128xf32>
    %2 = vector.shape_cast %1 : vector<1x8x128xf32> to vector<8x128xf32>
    %3 = vector.broadcast %0 : f32 to vector<8x128xf32>
    %4 = arith.mulf %3, %2 : vector<8x128xf32>
    %c1 = arith.constant 1 : index
    %5 = memref.load %arg1[%c1] : memref<10xf32, #tpu.memory_space<smem>>
    %c1_3 = arith.constant 1 : index
    %c0_4 = arith.constant 0 : index
    %c0_5 = arith.constant 0 : index
    %6 = vector.load %arg2[%c1_3, %c0_4, %c0_5] : memref<10x8x128xf32, #tpu.memory_space<vmem>>, vector<1x8x128xf32>
    %7 = vector.shape_cast %6 : vector<1x8x128xf32> to vector<8x128xf32>
    %8 = vector.broadcast %5 : f32 to vector<8x128xf32>
    %9 = arith.mulf %8, %7 : vector<8x128xf32>
    %10 = arith.addf %4, %9 : vector<8x128xf32>
    %c2 = arith.constant 2 : index
    %11 = memref.load %arg1[%c2] : memref<10xf32, #tpu.memory_space<smem>>
    %c2_6 = arith.constant 2 : index
    %c0_7 = arith.constant 0 : index
    %c0_8 = arith.constant 0 : index
    %12 = vector.load %arg2[%c2_6, %c0_7, %c0_8] : memref<10x8x128xf32, #tpu.memory_space<vmem>>, vector<1x8x128xf32>
    %13 = vector.shape_cast %12 : vector<1x8x128xf32> to vector<8x128xf32>
    %14 = vector.broadcast %11 : f32 to vector<8x128xf32>
    %15 = arith.mulf %14, %13 : vector<8x128xf32>
    %16 = arith.addf %10, %15 : vector<8x128xf32>
    %c3 = arith.constant 3 : index
    %17 = memref.load %arg1[%c3] : memref<10xf32, #tpu.memory_space<smem>>
    %c3_9 = arith.constant 3 : index
    %c0_10 = arith.constant 0 : index
    %c0_11 = arith.constant 0 : index
    %18 = vector.load %arg2[%c3_9, %c0_10, %c0_11] : memref<10x8x128xf32, #tpu.memory_space<vmem>>, vector<1x8x128xf32>
    %19 = vector.shape_cast %18 : vector<1x8x128xf32> to vector<8x128xf32>
    %20 = vector.broadcast %17 : f32 to vector<8x128xf32>
    %21 = arith.mulf %20, %19 : vector<8x128xf32>
    %22 = arith.addf %16, %21 : vector<8x128xf32>
    %c4 = arith.constant 4 : index
    %23 = memref.load %arg1[%c4] : memref<10xf32, #tpu.memory_space<smem>>
    %c4_12 = arith.constant 4 : index
    %c0_13 = arith.constant 0 : index
    %c0_14 = arith.constant 0 : index
    %24 = vector.load %arg2[%c4_12, %c0_13, %c0_14] : memref<10x8x128xf32, #tpu.memory_space<vmem>>, vector<1x8x128xf32>
    %25 = vector.shape_cast %24 : vector<1x8x128xf32> to vector<8x128xf32>
    %26 = vector.broadcast %23 : f32 to vector<8x128xf32>
    %27 = arith.mulf %26, %25 : vector<8x128xf32>
    %28 = arith.addf %22, %27 : vector<8x128xf32>
    %c5 = arith.constant 5 : index
    %29 = memref.load %arg1[%c5] : memref<10xf32, #tpu.memory_space<smem>>
    %c5_15 = arith.constant 5 : index
    %c0_16 = arith.constant 0 : index
    %c0_17 = arith.constant 0 : index
    %30 = vector.load %arg2[%c5_15, %c0_16, %c0_17] : memref<10x8x128xf32, #tpu.memory_space<vmem>>, vector<1x8x128xf32>
    %31 = vector.shape_cast %30 : vector<1x8x128xf32> to vector<8x128xf32>
    %32 = vector.broadcast %29 : f32 to vector<8x128xf32>
    %33 = arith.mulf %32, %31 : vector<8x128xf32>
    %34 = arith.addf %28, %33 : vector<8x128xf32>
    %c6 = arith.constant 6 : index
    %35 = memref.load %arg1[%c6] : memref<10xf32, #tpu.memory_space<smem>>
    %c6_18 = arith.constant 6 : index
    %c0_19 = arith.constant 0 : index
    %c0_20 = arith.constant 0 : index
    %36 = vector.load %arg2[%c6_18, %c0_19, %c0_20] : memref<10x8x128xf32, #tpu.memory_space<vmem>>, vector<1x8x128xf32>
    %37 = vector.shape_cast %36 : vector<1x8x128xf32> to vector<8x128xf32>
    %38 = vector.broadcast %35 : f32 to vector<8x128xf32>
    %39 = arith.mulf %38, %37 : vector<8x128xf32>
    %40 = arith.addf %34, %39 : vector<8x128xf32>
    %c7 = arith.constant 7 : index
    %41 = memref.load %arg1[%c7] : memref<10xf32, #tpu.memory_space<smem>>
    %c7_21 = arith.constant 7 : index
    %c0_22 = arith.constant 0 : index
    %c0_23 = arith.constant 0 : index
    %42 = vector.load %arg2[%c7_21, %c0_22, %c0_23] : memref<10x8x128xf32, #tpu.memory_space<vmem>>, vector<1x8x128xf32>
    %43 = vector.shape_cast %42 : vector<1x8x128xf32> to vector<8x128xf32>
    %44 = vector.broadcast %41 : f32 to vector<8x128xf32>
    %45 = arith.mulf %44, %43 : vector<8x128xf32>
    %46 = arith.addf %40, %45 : vector<8x128xf32>
    %c8 = arith.constant 8 : index
    %47 = memref.load %arg1[%c8] : memref<10xf32, #tpu.memory_space<smem>>
    %c8_24 = arith.constant 8 : index
    %c0_25 = arith.constant 0 : index
    %c0_26 = arith.constant 0 : index
    %48 = vector.load %arg2[%c8_24, %c0_25, %c0_26] : memref<10x8x128xf32, #tpu.memory_space<vmem>>, vector<1x8x128xf32>
    %49 = vector.shape_cast %48 : vector<1x8x128xf32> to vector<8x128xf32>
    %50 = vector.broadcast %47 : f32 to vector<8x128xf32>
    %51 = arith.mulf %50, %49 : vector<8x128xf32>
    %52 = arith.addf %46, %51 : vector<8x128xf32>
    %c9 = arith.constant 9 : index
    %53 = memref.load %arg1[%c9] : memref<10xf32, #tpu.memory_space<smem>>
    %c9_27 = arith.constant 9 : index
    %c0_28 = arith.constant 0 : index
    %c0_29 = arith.constant 0 : index
    %54 = vector.load %arg2[%c9_27, %c0_28, %c0_29] : memref<10x8x128xf32, #tpu.memory_space<vmem>>, vector<1x8x128xf32>
    %55 = vector.shape_cast %54 : vector<1x8x128xf32> to vector<8x128xf32>
    %56 = vector.broadcast %53 : f32 to vector<8x128xf32>
    %57 = arith.mulf %56, %55 : vector<8x128xf32>
    %58 = arith.addf %52, %57 : vector<8x128xf32>
    %59 = math.exp %58 : vector<8x128xf32>
    %c0_30 = arith.constant 0 : index
    %c0_31 = arith.constant 0 : index
    %60 = vector.load %arg3[%c0_30, %c0_31] : memref<8x128xf32, #tpu.memory_space<vmem>>, vector<8x128xf32>
    tpu.vector_store %arg3[%c0_30, %c0_31], %59 {strides = array<i32>} : memref<8x128xf32, #tpu.memory_space<vmem>>, vector<8x128xf32>,
    return
  }
  func.func @transform_0(%arg0: i32, %arg1: memref<10xf32, #tpu.memory_space<smem>>) -> (i32, i32, i32) {
    %c0_i32 = arith.constant 0 : i32
    %c0_i32_0 = arith.constant 0 : i32
    %c0_i32_1 = arith.constant 0 : i32
    return %c0_i32, %arg0, %c0_i32_0 : i32, i32, i32
  }
  func.func @transform_1(%arg0: i32, %arg1: memref<10xf32, #tpu.memory_space<smem>>) -> (i32, i32) {
    %c0_i32 = arith.constant 0 : i32
    %c0_i32_0 = arith.constant 0 : i32
    return %arg0, %c0_i32 : i32, i32
  }
}

</mosaic_0001>

<bundles_post_ra>
// kernel: tpu_custom_call.1
= control target key start
LH: loop header
LB: loop body
LE: loop exit
PB: predicated region body
PF: predicated region fallthrough
CT: control target
= control target key end

     0   :  { %s236_s0 = inlined_call_operand.hbm [shape: f32[10], index: 0, kind: input, shape index: {}]   ;;  %s237_s1 = inlined_call_operand.hbm [shape: f32[10,8,128], index: 1, kind: input, shape index: {}]   ;;  %s238_s2 = inlined_call_operand.hbm [shape: f32[8,128], index: 2, kind: output, shape index: {}]  }
   0x1   :  { %s120_s11 = scalar_lea.hbm %s236_s0, 16 }
   0x2   :  { %p121_p0 = scmp.ne.s32.totalorder %s236_s0, %s120_s11  ;;  %p124_p1 = scmp.lt.u32.totalorder %s120_s11, %s236_s0 }
   0x4   :  { %p126_p2 = pnand %p124_p1, %p121_p0 }
   0x6   :  { %129 = shalt.err (!%p126_p2)  }
   0x7   :  { %s180_s16 = smov [#allocation3]  }
   0x8   :  { %8 = dma.hbm_to_smem %s236_s0, 16, %s180_s16, [#allocation2] }
   0x9   :  { %174 = dma.done.wait [#allocation2], 16 }
   0xa   :  { %175 = vsyncadd [#allocation2], 4294967280 }
   0xb   :  { %10 = sfence }
   0xc   :  { %11 = vsyncpa [#allocation5], 0 }
   0xd   :  { %12 = vsyncpa [#allocation6], 0  ;;  %s181_s19 = smov [#allocation4]   ;;  %s130_s23 = scalar_lea.hbm %s237_s1, 1280 }
   0xe   :  { %s18_s20 = sshll.u32 %s181_s19, 4  ;;  %p131_p3 = scmp.ne.s32.totalorder %s237_s1, %s130_s23  ;;  %s19_s20 = int_to_ptr.vmem [resolvable:$true] %s18_s20 }
   0xf   :  { %p134_p4 = scmp.lt.u32.totalorder %s130_s23, %s237_s1 }
  0x11   :  { %p136_p5 = pnand %p134_p4, %p131_p3 }
  0x13   :  { %139 = shalt.err (!%p136_p5)
}
  0x14   :  { %s140_s0 = scalar_lea.vmem %s19_s20, 1280  ;;  %p145_p7 = scmp.lt.s32.totalorder %s19_s20, %s19_s20 }
  0x15   :  { %p141_p6 = scmp.ne.s32.totalorder %s19_s20, %s140_s0  ;;  %p146_p8 = scmp.lt.s32.totalorder %s140_s0, %s140_s0 }
  0x17   :  { %p147_p9 = por %p146_p8, %p145_p7 }
  0x19   :  { %p148_p10 = pnand %p147_p9, %p141_p6 }
  0x1b   :  { %151 = shalt.err (!%p148_p10)
}
  0x1c   :  { %s182_s28 = smov 128   ;;  %s183_s29 = smov 8  }
  0x1d   :  { %24 = dma.hbm_to_vmem [thread:$0]  %s237_s1, 1280, %s19_s20, [#allocation5], %s182_s28, %s182_s28, %s183_s29  }
  0x1e   :  { %176 = dma.done.wait [#allocation5], 1280  }
  0x1f   :  { %177 = vsyncadd [#allocation5], 4294966016  ;;  %s28_s4 = sld [smem:[#allocation3]]  ;;  %s104_s5 = sld [smem:[#allocation3 + $0x1]]  ;;  %v29_v0 = vld [vmem:[#allocation4] sm:$0xff]  ;;  %v34_v2 = vld [vmem:[#allocation4 + $0x8] sm:$0xff] }
  0x20   :  { %s105_s6 = sld [smem:[#allocation3 + $0x2]]  ;;  %s106_s7 = sld [smem:[#allocation3 + $0x3]]  ;;  %v40_v4 = vld [vmem:[#allocation4 + $0x10] sm:$0xff]  ;;  %v46_v8 = vld [vmem:[#allocation4 + $0x18] sm:$0xff]  ;;  %v52_v11 = vld [vmem:[#allocation4 + $0x20] sm:$0xff] }
  0x21   :  { %s107_s8 = sld [smem:[#allocation3 + $0x4]]  ;;  %s108_s9 = sld [smem:[#allocation3 + $0x5]]  ;;  %v58_v15 = vld [vmem:[#allocation4 + $0x28] sm:$0xff]  ;;  %v64_v19 = vld [vmem:[#allocation4 + $0x30] sm:$0xff]  ;;  %v70_v23 = vld [vmem:[#allocation4 + $0x38] sm:$0xff] }
  0x22   :  { %s109_s10 = sld [smem:[#allocation3 + $0x6]]  ;;  %s110_s11 = sld [smem:[#allocation3 + $0x7]]  ;;  %v76_v27 = vld [vmem:[#allocation4 + $0x40] sm:$0xff]  ;;  %v82_v31 = vld [vmem:[#allocation4 + $0x48] sm:$0xff] }
  0x23   :  { %s111_s1 = sld [smem:[#allocation3 + $0x8]]  ;;  %s112_s12 = sld [smem:[#allocation3 + $0x9]] }
  0x24   :  { %s184_s13 = smov [#allocation7]  }
  0x25   :  { %v30_v1 = vstv %s28_s4  ;;  %v35_v3 = vstv %s104_s5  ;;  %s95_s14 = sshll.u32 %s184_s13, 4  ;;  %s96_s14 = int_to_ptr.vmem [resolvable:$true] %s95_s14 }
  0x26   :  { %v31_v5 = vmul.f32 %v30_v1, %v29_v0  ;;  %v36_v6 = vmul.f32 %v35_v3, %v34_v2  ;;  %v41_v7 = vstv %s105_s6  ;;  %v47_v9 = vstv %s106_s7  ;;  %s152_s15 = scalar_lea.vmem %s96_s14, 128  ;;  %p157_p12 = scmp.lt.s32.totalorder %s96_s14, %s96_s14 }
  0x27   :  { %v42_v10 = vmul.f32 %v41_v7, %v40_v4  ;;  %v53_v12 = vstv %s107_s8  ;;  %v48_v14 = vmul.f32 %v47_v9, %v46_v8  ;;  %v59_v16 = vstv %s108_s9  ;;  %p153_p11 = scmp.ne.s32.totalorder %s96_s14, %s152_s15  ;;  %p158_p13 = scmp.lt.s32.totalorder %s152_s15, %s152_s15 }
  0x28   :  { %v37_v13 = vadd.f32 %v36_v6, %v31_v5  ;;  %v54_v18 = vmul.f32 %v53_v12, %v52_v11  ;;  %v65_v20 = vstv %s109_s10  ;;  %v60_v22 = vmul.f32 %v59_v16, %v58_v15 }
  0x29   :  { %v71_v24 = vstv %s110_s11  ;;  %v66_v26 = vmul.f32 %v65_v20, %v64_v19  ;;  %v77_v28 = vstv %s111_s1  ;;  %v83_v32 = vstv %s112_s12  ;;  %p159_p0 = por %p158_p13, %p157_p12 }
  0x2a   :  { %v43_v17 = vadd.f32 %v42_v10, %v37_v13  ;;  %v72_v30 = vmul.f32 %v71_v24, %v70_v23  ;;  %v78_v34 = vmul.f32 %v77_v28, %v76_v27  ;;  %v84_v36 = vmul.f32 %v83_v32, %v82_v31 }
  0x2b   :  { %p160_p1 = pnand %p159_p0, %p153_p11 }
  0x2c   :  { %v49_v21 = vadd.f32 %v48_v14, %v43_v17 }
  0x2e   :  { %v55_v25 = vadd.f32 %v54_v18, %v49_v21 }
  0x30   :  { %v61_v29 = vadd.f32 %v60_v22, %v55_v25 }
  0x32   :  { %v67_v33 = vadd.f32 %v66_v26, %v61_v29 }
  0x34   :  { %v73_v35 = vadd.f32 %v72_v30, %v67_v33 }
  0x36   :  { %v79_v37 = vadd.f32 %v78_v34, %v73_v35 }
  0x38   :  { %v85_v38 = vadd.f32 %v84_v36, %v79_v37 }
  0x3a   :  { %v86_v39 = vmul.f32 1.442695, %v85_v38 }
  0x3c   :  { %118 = vpow2.f32 %v86_v39 }
  0x46   :  { %v119_v40 = vpop.eup %118 }
  0x47   :  { %88 = vst [vmem:[#allocation7] sm:$0xff] %v119_v40 }
  0x48   :  { %163 = shalt.err (!%p160_p1)
}
  0x49   :  { %s164_s18 = scalar_lea.hbm %s238_s2, 128 }
  0x4a   :  { %p165_p2 = scmp.ne.s32.totalorder %s238_s2, %s164_s18  ;;  %p168_p3 = scmp.lt.u32.totalorder %s164_s18, %s238_s2 }
  0x4c   :  { %p170_p4 = pnand %p168_p3, %p165_p2 }
  0x4e   :  { %173 = shalt.err (!%p170_p4)
}
  0x4f   :  { %98 = dma.vmem_to_hbm [thread:$0]  %s96_s14, 128, %s238_s2, [#allocation6]  }
  0x50   :  { %178 = dma.done.wait [#allocation6], 128  }
  0x51   :  { %179 = vsyncadd [#allocation6], 4294967168 }
  0x52   :  { %102 = vsyncpa [#allocation5], 1 }
  0x53   :  { %103 = vsyncpa [#allocation6], 1 }

</bundles_post_ra>
